<compile_context>
chip_gen: v7x
topology: tpu7x:2x2x1
jax: 0.10.0
libtpu: 0.0.40
codegen_flags: <defaults>
</compile_context>

<pallas_src>
import functools

import jax
import jax.numpy as jnp
from jax.experimental import pallas as pl
from jax.experimental.pallas import tpu as pltpu

_LANE = 128
_SUBLANE = 16           # multiple of 8; 16 also keeps bf16 sublane packing aligned
_MAX_BLOCK_ROWS = 512   # 512x128 f32 plane = 256 KiB; 3 planes x 2 inputs x 2 bufs ~ 3 MiB


# ---------------------------------------------------------------------------
# Kernels
# ---------------------------------------------------------------------------
def _plane_l1(p_ref, g_ref):
    """|p - g| summed over the 3 coordinate planes — pure elementwise VPU work."""
    acc = None
    for c in range(3):
        d = jnp.abs(p_ref[c].astype(jnp.float32) - g_ref[c].astype(jnp.float32))
        acc = d if acc is None else acc + d
    return acc


def _l1_reduce_kernel(scale_ref, p_ref, g_ref, out_ref):
    """Accumulate sum(|pred-gt|) over row-tiles into an SMEM scalar; scale at end."""
    r = pl.program_id(0)

    @pl.when(r == 0)
    def _init():
        out_ref[0, 0] = 0.0

    out_ref[0, 0] += jnp.sum(_plane_l1(p_ref, g_ref))

    @pl.when(r == pl.num_programs(0) - 1)
    def _finalize():
        out_ref[0, 0] *= scale_ref[0]   # 1/(B*J) for 'mean', 1.0 for 'sum'


def _l1_none_kernel(p_ref, g_ref, out_ref):
    """Per-point L1 distance written to a lane-dense (rows, 128) slab."""
    out_ref[...] = _plane_l1(p_ref, g_ref)


# ---------------------------------------------------------------------------
# Wrapper helpers
# ---------------------------------------------------------------------------
def _tiling(n_points):
    """Pick (total_rows, rows_per_block) for the lane-dense (rows, 128) layout."""
    rows = max(1, -(-n_points // _LANE))
    rows = -(-rows // _SUBLANE) * _SUBLANE
    if rows <= _MAX_BLOCK_ROWS:
        return rows, rows                       # single block, grid of 1
    tile = _MAX_BLOCK_ROWS
    rows = -(-rows // tile) * tile              # pad so grid divides evenly
    return rows, tile


def _to_planes(x, rows):
    """(B, J, 3) -> lane-dense (3, rows, 128), zero padded, original dtype kept."""
    B, J, C = x.shape
    n = B * J
    planes = x.reshape(n, C).T                  # (3, N)
    planes = jnp.pad(planes, ((0, 0), (0, rows * _LANE - n)))
    return planes.reshape(C, rows, _LANE)


# ---------------------------------------------------------------------------
# Public entry point
# ---------------------------------------------------------------------------
@functools.partial(jax.jit, static_argnames="reduction")
def joint_position_loss(pred_joints, gt_joints, reduction="mean"):
    """Pallas implementation of JointPositionLoss.forward.

    Args:
      pred_joints: (B, J, 3) float array.
      gt_joints:   (B, J, 3) float array.
      reduction:   'mean' | 'sum' | 'none'
    Returns:
      scalar (for 'mean'/'sum') or (B, J) array (for 'none'), in the input dtype.
    """
    if pred_joints.shape != gt_joints.shape:
        raise ValueError("pred_joints and gt_joints must have the same shape")
    B, J, C = pred_joints.shape
    if C != 3:
        raise ValueError("last dim must be 3")

    n = B * J
    rows, tile_rows = _tiling(n)
    grid = (rows // tile_rows,)

    p_planes = _to_planes(pred_joints, rows)
    g_planes = _to_planes(gt_joints, rows)

    plane_spec = pl.BlockSpec((3, tile_rows, _LANE), lambda r: (0, r, 0))

    if reduction in ("mean", "sum"):
        scale = jnp.full((1,), (1.0 / n) if reduction == "mean" else 1.0,
                         dtype=jnp.float32)
        out = pl.pallas_call(
            _l1_reduce_kernel,
            out_shape=jax.ShapeDtypeStruct((1, 1), jnp.float32),
            grid_spec=pltpu.PrefetchScalarGridSpec(
                num_scalar_prefetch=0,
                grid=grid,
                in_specs=[pl.BlockSpec(memory_space=pltpu.SMEM),  # scale scalar
                          plane_spec, plane_spec],
                out_specs=pl.BlockSpec(memory_space=pltpu.SMEM)),
            compiler_params=pltpu.CompilerParams(
                dimension_semantics=("arbitrary",)),   # sequential accumulation
        )(scale, p_planes, g_planes)
        return out.reshape(()).astype(pred_joints.dtype)

    elif reduction == "none":
        out = pl.pallas_call(
            _l1_none_kernel,
            out_shape=jax.ShapeDtypeStruct((rows, _LANE), jnp.float32),
            grid_spec=pltpu.PrefetchScalarGridSpec(
                num_scalar_prefetch=0,
                grid=grid,
                in_specs=[plane_spec, plane_spec],
                out_specs=pl.BlockSpec((tile_rows, _LANE), lambda r: (r, 0))),
            compiler_params=pltpu.CompilerParams(
                dimension_semantics=("parallel",)),    # megacore-shardable on v7x
        )(p_planes, g_planes)
        return out.reshape(-1)[:n].reshape(B, J).astype(pred_joints.dtype)

    else:
        raise ValueError(f"unknown reduction: {reduction}")


# ---------------------------------------------------------------------------
# Demo / self-check
# ---------------------------------------------------------------------------
if __name__ == "__main__":
    key = jax.random.PRNGKey(0)

    def _check(B, J, key):
        k1, k2 = jax.random.split(key)
        pred = jax.random.normal(k1, (B, J, 3), dtype=jnp.float32)
        gt = jax.random.normal(k2, (B, J, 3), dtype=jnp.float32)

        # Pure-JAX reference (mirrors the PyTorch forward exactly).
        l1_ref = jnp.abs(pred - gt).sum(axis=-1)
        ref_mean = l1_ref.mean()
        ref_sum = l1_ref.sum()

        out_mean = jax.block_until_ready(joint_position_loss(pred, gt, reduction="mean"))
        out_sum = jax.block_until_ready(joint_position_loss(pred, gt, reduction="sum"))
        out_none = jax.block_until_ready(joint_position_loss(pred, gt, reduction="none"))

        assert jnp.allclose(out_mean, ref_mean, rtol=1e-5, atol=1e-5)
        assert jnp.allclose(out_sum, ref_sum, rtol=1e-5, atol=1e-5)
        assert out_none.shape == (B, J)
        assert jnp.allclose(out_none, l1_ref, rtol=1e-5, atol=1e-5)

    k1, k2 = jax.random.split(key)
    _check(2, 8, k1)    # small, power-of-two point count
    _check(5, 17, k2)   # ragged point count exercises padding/slicing

    print("KERNEL_OK")
</pallas_src>

<mosaic_0001>
module attributes {stable_mosaic.version = 11 : i64} {
  func.func @_l1_reduce_kernel(%arg0: i32, %arg1: memref<1xf32, #tpu.memory_space<smem>>, %arg2: memref<3x16x128xf32, #tpu.memory_space<vmem>>, %arg3: memref<3x16x128xf32, #tpu.memory_space<vmem>>, %arg4: memref<1x1xf32, #tpu.memory_space<smem>>) attributes {dimension_semantics = [#tpu.dimension_semantics<arbitrary>], iteration_bounds = array<i64: 1>, scalar_prefetch = 0 : i64, scratch_operands = 0 : i64, tpu.core_type = #tpu.core_type<tc>, window_params = [{transform_indices = @transform_0, window_bounds = array<i64: 1>}, {transform_indices = @transform_1, window_bounds = array<i64: 3, 16, 128>}, {transform_indices = @transform_2, window_bounds = array<i64: 3, 16, 128>}, {transform_indices = @transform_3, window_bounds = array<i64: 1, 1>}]} {
    %c0_i32 = arith.constant 0 : i32
    %0 = arith.cmpi eq, %arg0, %c0_i32 : i32
    %1 = arith.extui %0 : i1 to i32
    %c0_i32_0 = arith.constant 0 : i32
    %2 = arith.cmpi ne, %1, %c0_i32_0 : i32
    scf.if %2 {
      %cst_22 = arith.constant 0.000000e+00 : f32
      %c0_23 = arith.constant 0 : index
      %c0_24 = arith.constant 0 : index
      %33 = memref.load %arg4[%c0_23, %c0_24] : memref<1x1xf32, #tpu.memory_space<smem>>
      memref.store %cst_22, %arg4[%c0_23, %c0_24] : memref<1x1xf32, #tpu.memory_space<smem>>
    } else {
    }
    %c0 = arith.constant 0 : index
    %c0_1 = arith.constant 0 : index
    %3 = memref.load %arg4[%c0, %c0_1] : memref<1x1xf32, #tpu.memory_space<smem>>
    %c0_2 = arith.constant 0 : index
    %c0_3 = arith.constant 0 : index
    %c0_4 = arith.constant 0 : index
    %4 = vector.load %arg2[%c0_2, %c0_3, %c0_4] : memref<3x16x128xf32, #tpu.memory_space<vmem>>, vector<1x16x128xf32>
    %5 = vector.shape_cast %4 : vector<1x16x128xf32> to vector<16x128xf32>
    %c0_5 = arith.constant 0 : index
    %c0_6 = arith.constant 0 : index
    %c0_7 = arith.constant 0 : index
    %6 = vector.load %arg3[%c0_5, %c0_6, %c0_7] : memref<3x16x128xf32, #tpu.memory_space<vmem>>, vector<1x16x128xf32>
    %7 = vector.shape_cast %6 : vector<1x16x128xf32> to vector<16x128xf32>
    %8 = arith.subf %5, %7 : vector<16x128xf32>
    %9 = math.absf %8 : vector<16x128xf32>
    %c1 = arith.constant 1 : index
    %c0_8 = arith.constant 0 : index
    %c0_9 = arith.constant 0 : index
    %10 = vector.load %arg2[%c1, %c0_8, %c0_9] : memref<3x16x128xf32, #tpu.memory_space<vmem>>, vector<1x16x128xf32>
    %11 = vector.shape_cast %10 : vector<1x16x128xf32> to vector<16x128xf32>
    %c1_10 = arith.constant 1 : index
    %c0_11 = arith.constant 0 : index
    %c0_12 = arith.constant 0 : index
    %12 = vector.load %arg3[%c1_10, %c0_11, %c0_12] : memref<3x16x128xf32, #tpu.memory_space<vmem>>, vector<1x16x128xf32>
    %13 = vector.shape_cast %12 : vector<1x16x128xf32> to vector<16x128xf32>
    %14 = arith.subf %11, %13 : vector<16x128xf32>
    %15 = math.absf %14 : vector<16x128xf32>
    %16 = arith.addf %9, %15 : vector<16x128xf32>
    %c2 = arith.constant 2 : index
    %c0_13 = arith.constant 0 : index
    %c0_14 = arith.constant 0 : index
    %17 = vector.load %arg2[%c2, %c0_13, %c0_14] : memref<3x16x128xf32, #tpu.memory_space<vmem>>, vector<1x16x128xf32>
    %18 = vector.shape_cast %17 : vector<1x16x128xf32> to vector<16x128xf32>
    %c2_15 = arith.constant 2 : index
    %c0_16 = arith.constant 0 : index
    %c0_17 = arith.constant 0 : index
    %19 = vector.load %arg3[%c2_15, %c0_16, %c0_17] : memref<3x16x128xf32, #tpu.memory_space<vmem>>, vector<1x16x128xf32>
    %20 = vector.shape_cast %19 : vector<1x16x128xf32> to vector<16x128xf32>
    %21 = arith.subf %18, %20 : vector<16x128xf32>
    %22 = math.absf %21 : vector<16x128xf32>
    %23 = arith.addf %16, %22 : vector<16x128xf32>
    %24 = vector.shape_cast %23 : vector<16x128xf32> to vector<1x16x128xf32>
    %cst = arith.constant dense<0.000000e+00> : vector<1xf32>
    %25 = vector.multi_reduction <add>, %24, %cst [1, 2] : vector<1x16x128xf32> to vector<1xf32>
    %26 = vector.shape_cast %25 : vector<1xf32> to vector<1x1x1xf32>
    %27 = vector.extract %26[0, 0, 0] : f32 from vector<1x1x1xf32>
    %28 = arith.addf %3, %27 : f32
    %c0_18 = arith.constant 0 : index
    %c0_19 = arith.constant 0 : index
    %29 = memref.load %arg4[%c0_18, %c0_19] : memref<1x1xf32, #tpu.memory_space<smem>>
    memref.store %28, %arg4[%c0_18, %c0_19] : memref<1x1xf32, #tpu.memory_space<smem>>
    %c0_i32_20 = arith.constant 0 : i32
    %30 = arith.cmpi eq, %arg0, %c0_i32_20 : i32
    %31 = arith.extui %30 : i1 to i32
    %c0_i32_21 = arith.constant 0 : i32
    %32 = arith.cmpi ne, %31, %c0_i32_21 : i32
    scf.if %32 {
      %c0_22 = arith.constant 0 : index
      %c0_23 = arith.constant 0 : index
      %33 = memref.load %arg4[%c0_22, %c0_23] : memref<1x1xf32, #tpu.memory_space<smem>>
      %c0_24 = arith.constant 0 : index
      %34 = memref.load %arg1[%c0_24] : memref<1xf32, #tpu.memory_space<smem>>
      %35 = arith.mulf %33, %34 : f32
      %c0_25 = arith.constant 0 : index
      %c0_26 = arith.constant 0 : index
      %36 = memref.load %arg4[%c0_25, %c0_26] : memref<1x1xf32, #tpu.memory_space<smem>>
      memref.store %35, %arg4[%c0_25, %c0_26] : memref<1x1xf32, #tpu.memory_space<smem>>
    } else {
    }
    return
  }
  func.func @transform_0(%arg0: i32) -> i32 {
    %c0_i32 = arith.constant 0 : i32
    %c0_i32_0 = arith.constant 0 : i32
    return %c0_i32 : i32
  }
  func.func @transform_1(%arg0: i32) -> (i32, i32, i32) {
    %c0_i32 = arith.constant 0 : i32
    %c0_i32_0 = arith.constant 0 : i32
    %c0_i32_1 = arith.constant 0 : i32
    return %c0_i32, %arg0, %c0_i32_0 : i32, i32, i32
  }
  func.func @transform_2(%arg0: i32) -> (i32, i32, i32) {
    %c0_i32 = arith.constant 0 : i32
    %c0_i32_0 = arith.constant 0 : i32
    %c0_i32_1 = arith.constant 0 : i32
    return %c0_i32, %arg0, %c0_i32_0 : i32, i32, i32
  }
  func.func @transform_3(%arg0: i32) -> (i32, i32) {
    %c0_i32 = arith.constant 0 : i32
    %c0_i32_0 = arith.constant 0 : i32
    %c0_i32_1 = arith.constant 0 : i32
    return %c0_i32, %c0_i32_0 : i32, i32
  }
}

</mosaic_0001>

<bundles_post_ra>
// kernel: joint_position_loss.1
= control target key start
LH: loop header
LB: loop body
LE: loop exit
PB: predicated region body
PF: predicated region fallthrough
CT: control target
= control target key end

     0   :  { %s184_s0 = inlined_call_operand.<no memory space> [shape: f32[1], index: 0, kind: input, shape index: {}]   ;;  %s185_s1 = inlined_call_operand.vmem [shape: f32[3,16,128], index: 1, kind: input, shape index: {}]   ;;  %s186_s2 = inlined_call_operand.vmem [shape: f32[3,16,128], index: 2, kind: input, shape index: {}]   ;;  %s187_s3 = inlined_call_operand.hbm [shape: f32[1,1], index: 3, kind: output, shape index: {}]  }
   0x1   :  { %v23_v0 = vld [vmem:[%s185_s1] sm:$0xff]  ;;  %v24_v1 = vld [vmem:[%s185_s1 + $0x8] sm:$0xff]  ;;  %v88_v5 = vld [vmem:[%s185_s1 + $0x10] sm:$0xff] }
   0x2   :  { %v25_v2 = vld [vmem:[%s186_s2] sm:$0xff]  ;;  %v26_v3 = vld [vmem:[%s186_s2 + $0x8] sm:$0xff]  ;;  %v89_v6 = vld [vmem:[%s185_s1 + $0x18] sm:$0xff] }
   0x3   :  { %v27_v4 = vsub.f32 %v23_v0, %v25_v2  ;;  %v28_v7 = vsub.f32 %v24_v1, %v26_v3  ;;  %v90_v8 = vld [vmem:[%s186_s2 + $0x10] sm:$0xff]  ;;  %v91_v9 = vld [vmem:[%s186_s2 + $0x18] sm:$0xff]  ;;  %v92_v10 = vld [vmem:[%s185_s1 + $0x20] sm:$0xff] }
   0x4   :  { %v37_v12 = vsub.f32 %v88_v5, %v90_v8  ;;  %v38_v13 = vsub.f32 %v89_v6, %v91_v9  ;;  %v93_v14 = vld [vmem:[%s185_s1 + $0x28] sm:$0xff]  ;;  %v94_v15 = vld [vmem:[%s186_s2 + $0x20] sm:$0xff] }
   0x5   :  { %v29_v11 = vand.u32 2147483647, %v27_v4  ;;  %v95_v16 = vld [vmem:[%s186_s2 + $0x28] sm:$0xff]  ;;  %v30_v17 = vand.u32 2147483647, %v28_v7  ;;  %v49_v18 = vsub.f32 %v92_v10, %v94_v15 }
   0x6   :  { %v50_v19 = vsub.f32 %v93_v14, %v95_v16 }
   0x7   :  { %9 = vsyncpa [#allocation4], 0  ;;  %v39_v20 = vand.u32 2147483647, %v37_v12  ;;  %v40_v21 = vand.u32 2147483647, %v38_v13 }
   0x8   :  { %v51_v22 = vand.u32 2147483647, %v49_v18  ;;  %v52_v23 = vand.u32 2147483647, %v50_v19  ;;  %s100_s13 = scalar_lea.hbm %s187_s3, 16 }
   0x9   :  { %v41_v24 = vadd.f32 %v39_v20, %v29_v11  ;;  %v42_v25 = vadd.f32 %v40_v21, %v30_v17  ;;  %p101_p0 = scmp.ne.s32.totalorder %s187_s3, %s100_s13  ;;  %p104_p1 = scmp.lt.u32.totalorder %s100_s13, %s187_s3 }
   0xb   :  { %v53_v26 = vadd.f32 %v51_v22, %v41_v24  ;;  %v54_v27 = vadd.f32 %v52_v23, %v42_v25  ;;  %p106_p2 = pnand %p104_p1, %p101_p0 }
   0xd   :  { %v55_v28 = vadd.f32 %v54_v27, %v53_v26 }
   0xf   :  { %56 = vadd.xlane.f32.xlu0 %v55_v28 }
  0x9c   :  { %v57_v29 = vpop.xlane.xlu0 %56 }
  0x9d   :  { %v58_v30 = vrot.slane %v57_v29, 4 }
  0x9f   :  { %v59_v31 = vadd.f32 %v58_v30, %v57_v29 }
  0xa1   :  { %v60_v32 = vrot.slane %v59_v31, 2 }
  0xa3   :  { %v61_v33 = vadd.f32 %v60_v32, %v59_v31 }
  0xa5   :  { %v62_v34 = vrot.slane %v61_v33, 1 }
  0xa7   :  { %v63_v35 = vadd.f32 %v62_v34, %v61_v33 }
  0xa9   :  { %96 = vpush %v63_v35 }
  0xda   :  { %s97_s1 = spop %96 }
  0xdb   :  { %s73_s10 = smul.f32 %s97_s1, %s184_s0 }
  0xdd   :  { %74 = sst [smem:[#allocation3]] %s73_s10 }
  0xde   :  { %109 = shalt.err (!%p106_p2)
}
  0xdf   :  { %s112_s18 = smov [#allocation3]  }
  0xe0   :  { %82 = dma.smem_to_hbm %s112_s18, 16, %s187_s3, [#allocation4]  }
  0xe1   :  { %110 = dma.done.wait [#allocation4], 16  }
  0xe2   :  { %111 = vsyncadd [#allocation4], 4294967280 }
  0xe3   :  { %86 = sfence }
  0xe4   :  { %87 = vsyncpa [#allocation4], 1 }

</bundles_post_ra>
